<compile_context>
chip_gen: v7x
topology: tpu7x:2x2x1
jax: 0.10.0
libtpu: 0.0.40
codegen_flags: <defaults>
</compile_context>

<pallas_src>
import jax
import jax.numpy as jnp
from jax.experimental import pallas as pl
from jax.experimental.pallas import tpu as pltpu

INPUT_SIZE = 196            # 14 * 14
HIDDEN_PIPE = 500
HIDDEN_PAD = 512            # hidden padded to a lane-tile multiple (zero cols)
OUT_PIPE = 10
HIDDEN_CLS = 50
OUT_CLS = 2
X_ROW = 2 * INPUT_SIZE                      # [x1 | x2] = 392 lanes per row
COMB = 2 * OUT_PIPE + HIDDEN_CLS            # fused 2nd layer output = 70 cols
SLAB = 2 * OUT_PIPE + OUT_CLS               # [p1 | p2 | out] = 22 cols
TILE_B_MAX = 512                            # batch rows per grid step


def _cdiv(a, b):
    return -(-a // b)


def _round_up(x, m):
    return _cdiv(x, m) * m


# ----------------------------------------------------------------------------
# Kernel
# ----------------------------------------------------------------------------
def _shallow_fc_kernel(
    x_ref,                         # (TILE_B, 392) f32 : rows are [x1 | x2]
    w1a_ref, b1a_ref,              # pipe1 first layer (196,512) bf16 / (1,512) f32
    w1b_ref, b1b_ref,              # pipe2 first layer
    w2t_ref, w2b_ref, bcmb_ref,    # fused layer: (512,70) bf16 x2 / (1,70) f32
    wc2_ref, bc2_ref,              # classifier tail (50,2) bf16 / (1,2) f32
    out_ref,                       # (TILE_B, 22) f32 = [p1 | p2 | out]
):
    xf = x_ref[...]
    x1 = xf[:, :INPUT_SIZE].astype(jnp.bfloat16)     # lane tiles 0..1, no move
    x2 = xf[:, INPUT_SIZE:].astype(jnp.bfloat16)     # one cheap lane shift

    # First layers: two separate K=196 matmuls (block-diag here would double
    # padded MXU area).  bf16 x bf16 -> f32; bias + ReLU + bf16 cast fused.
    h1 = jnp.dot(x1, w1a_ref[...], preferred_element_type=jnp.float32)
    h1 = jnp.maximum(h1 + b1a_ref[...], 0.0).astype(jnp.bfloat16)
    h2 = jnp.dot(x2, w1b_ref[...], preferred_element_type=jnp.float32)
    h2 = jnp.maximum(h2 + b1b_ref[...], 0.0).astype(jnp.bfloat16)

    # Fused second layer + concat + classifier-first-layer: two K=512 matmuls
    # summed (same padded MXU area as a K=1024 block-diag, but the (B,1024)
    # hidden concat is never materialized).
    comb = (jnp.dot(h1, w2t_ref[...], preferred_element_type=jnp.float32)
            + jnp.dot(h2, w2b_ref[...], preferred_element_type=jnp.float32)
            + bcmb_ref[...])                          # (TILE_B, 70)
    p_cat = comb[:, :2 * OUT_PIPE]                    # [p1 | p2]
    hc = jnp.maximum(comb[:, 2 * OUT_PIPE:], 0.0).astype(jnp.bfloat16)

    out_cls = jnp.dot(hc, wc2_ref[...],
                      preferred_element_type=jnp.float32) + bc2_ref[...]

    # Single lane-dense store instead of three tiny masked writebacks.
    out_ref[...] = jnp.concatenate([p_cat, out_cls], axis=1).astype(out_ref.dtype)


# ----------------------------------------------------------------------------
# Wrapper
# ----------------------------------------------------------------------------
def _resident_spec(arr):
    """Full-array block with a constant index_map -> stays VMEM-resident."""
    nd = arr.ndim
    return pl.BlockSpec(arr.shape, lambda i, _nd=nd: (0,) * _nd)


def _select_tile_b(b8):
    # >= 2 grid steps whenever the batch allows, so v7x can shard the
    # "parallel" batch axis across both TensorCores.
    tile = _round_up(_cdiv(b8, 2), 8)
    return max(8, min(TILE_B_MAX, tile))


@jax.jit
def shallow_fc_forward(x, packed_params):
    """x: (B, 2, 14, 14) f32 NCHW.  Returns (x_main, (x1_pipe, x2_pipe))."""
    # NOTE: if the upstream producer can emit bf16 activations, feeding x as
    # bf16 would halve the dominant input DMA (kernel math is unchanged).
    B = x.shape[0]
    x2d = x.reshape(B, X_ROW)                         # contiguous -> free reshape

    b8 = _round_up(B, 8)                              # tiny pad only (<= 7 rows)
    if b8 != B:
        x2d = jnp.pad(x2d, ((0, b8 - B), (0, 0)))

    tile_b = _select_tile_b(b8)
    grid = (_cdiv(b8, tile_b),)                       # ragged last block is masked

    slab = pl.pallas_call(
        _shallow_fc_kernel,
        out_shape=jax.ShapeDtypeStruct((b8, SLAB), jnp.float32),
        grid=grid,
        in_specs=[pl.BlockSpec((tile_b, X_ROW), lambda i: (i, 0))]
                 + [_resident_spec(p) for p in packed_params],
        out_specs=pl.BlockSpec((tile_b, SLAB), lambda i: (i, 0)),
        compiler_params=pltpu.CompilerParams(
            dimension_semantics=("parallel",),
            vmem_limit_bytes=32 * 1024 * 1024),
    )(x2d, *packed_params)

    p1 = slab[:B, :OUT_PIPE]
    p2 = slab[:B, OUT_PIPE:2 * OUT_PIPE]
    out = slab[:B, 2 * OUT_PIPE:]
    return out, (p1, p2)


# ----------------------------------------------------------------------------
# Parameters
# ----------------------------------------------------------------------------
def init_params(key, weight_sharing=False):
    """nn.Linear-style init (uniform +-1/sqrt(fan_in)); weights (fan_in, fan_out)."""
    def linear(key, fan_in, fan_out):
        kw, kb = jax.random.split(key)
        bound = 1.0 / jnp.sqrt(fan_in)
        w = jax.random.uniform(kw, (fan_in, fan_out), jnp.float32, -bound, bound)
        b = jax.random.uniform(kb, (1, fan_out), jnp.float32, -bound, bound)
        return w, b

    keys = jax.random.split(key, 6)
    w1a, b1a = linear(keys[0], INPUT_SIZE, HIDDEN_PIPE)
    w2a, b2a = linear(keys[1], HIDDEN_PIPE, OUT_PIPE)
    if weight_sharing:
        # TODO(synk): with shared weights a stacked (2B,196) single-pipe
        # variant would halve weight VMEM/DMA and first-layer matmul count.
        w1b, b1b, w2b, b2b = w1a, b1a, w2a, b2a
    else:
        w1b, b1b = linear(keys[2], INPUT_SIZE, HIDDEN_PIPE)
        w2b, b2b = linear(keys[3], HIDDEN_PIPE, OUT_PIPE)
    wc1, bc1 = linear(keys[4], 2 * OUT_PIPE, HIDDEN_CLS)
    wc2, bc2 = linear(keys[5], HIDDEN_CLS, OUT_CLS)
    return (w1a, b1a, w2a, b2a, w1b, b1b, w2b, b2b, wc1, bc1, wc2, bc2)


def pack_params(raw):
    """Host-side packing: pad hidden 500->512, block-diag second layer, fold the
    classifier's first Linear into it, split into 512-row halves, bf16 weights."""
    (w1a, b1a, w2a, b2a, w1b, b1b, w2b, b2b, wc1, bc1, wc2, bc2) = raw
    H = HIDDEN_PAD

    # Block-diagonal second layer (zero-padded hidden 500 -> 512 per pipe).
    w2_blk = jnp.zeros((2 * H, 2 * OUT_PIPE), jnp.float32)
    w2_blk = w2_blk.at[:HIDDEN_PIPE, :OUT_PIPE].set(w2a)
    w2_blk = w2_blk.at[H:H + HIDDEN_PIPE, OUT_PIPE:].set(w2b)
    b2_cat = jnp.concatenate([b2a, b2b], axis=1)                     # (1, 20)

    # Fold classifier Linear(20,50): cols [:20]=p_cat, cols [20:70]=pre-ReLU hc.
    wcomb = jnp.concatenate([w2_blk, w2_blk @ wc1], axis=1)          # (1024, 70)
    bcomb = jnp.concatenate([b2_cat, b2_cat @ wc1 + bc1], axis=1)    # (1, 70)

    pad_w = lambda w: jnp.pad(w, ((0, 0), (0, H - HIDDEN_PIPE)))
    pad_b = lambda b: jnp.pad(b, ((0, 0), (0, H - HIDDEN_PIPE)))
    bf = lambda w: w.astype(jnp.bfloat16)
    return (bf(pad_w(w1a)), pad_b(b1a),
            bf(pad_w(w1b)), pad_b(b1b),
            bf(wcomb[:H]), bf(wcomb[H:]), bcomb,
            bf(wc2), bc2)


# ----------------------------------------------------------------------------
# Pure-JAX reference (unfused; mirrors the kernel's bf16-weight math)
# ----------------------------------------------------------------------------
def reference_forward(x, raw_params):
    B = x.shape[0]
    (w1a, b1a, w2a, b2a, w1b, b1b, w2b, b2b, wc1, bc1, wc2, bc2) = raw_params
    bf = lambda a: a.astype(jnp.bfloat16)
    dot = lambda a, b: jnp.dot(a, b, preferred_element_type=jnp.float32)

    x1 = bf(x[:, 0, :, :].reshape(B, INPUT_SIZE))
    x2 = bf(x[:, 1, :, :].reshape(B, INPUT_SIZE))
    h1 = jnp.maximum(dot(x1, bf(w1a)) + b1a, 0.0)
    h2 = jnp.maximum(dot(x2, bf(w1b)) + b1b, 0.0)
    p1 = dot(bf(h1), bf(w2a)) + b2a
    p2 = dot(bf(h2), bf(w2b)) + b2b
    cat = jnp.concatenate([p1, p2], axis=1)
    hc = jnp.maximum(dot(bf(cat), bf(wc1)) + bc1, 0.0)
    out = dot(bf(hc), bf(wc2)) + bc2
    return out, (p1, p2)


# ----------------------------------------------------------------------------
if __name__ == "__main__":
    key = jax.random.PRNGKey(0)
    kp, kx1, kx2, kx3 = jax.random.split(key, 4)

    params_raw = init_params(kp, weight_sharing=False)
    params_packed = pack_params(params_raw)

    def check(B, kxi):
        x = jax.random.normal(kxi, (B, 2, 14, 14), dtype=jnp.float32)
        out, (p1, p2) = shallow_fc_forward(x, params_packed)
        jax.block_until_ready((out, p1, p2))
        ref_out, (ref_p1, ref_p2) = reference_forward(x, params_raw)
        assert out.shape == (B, OUT_CLS)
        assert p1.shape == (B, OUT_PIPE) and p2.shape == (B, OUT_PIPE)
        assert jnp.allclose(p1, ref_p1, atol=1e-2, rtol=1e-2)
        assert jnp.allclose(p2, ref_p2, atol=1e-2, rtol=1e-2)
        assert jnp.allclose(out, ref_out, atol=2e-2, rtol=2e-2)

    check(2, kx1)     # tiny batch (single grid step, padded to 8 rows)
    check(13, kx2)    # non-multiple-of-8 batch (tiny row pad + 2-step grid)
    check(600, kx3)   # multi-step grid with a ragged (masked) last block

    print("KERNEL_OK")
</pallas_src>

<mosaic_0001>
module attributes {stable_mosaic.version = 11 : i64} {
  func.func @_shallow_fc_kernel(%arg0: i32, %arg1: memref<8x392xf32, #tpu.memory_space<vmem>>, %arg2: memref<196x512xbf16, #tpu.memory_space<vmem>>, %arg3: memref<1x512xf32, #tpu.memory_space<vmem>>, %arg4: memref<196x512xbf16, #tpu.memory_space<vmem>>, %arg5: memref<1x512xf32, #tpu.memory_space<vmem>>, %arg6: memref<512x70xbf16, #tpu.memory_space<vmem>>, %arg7: memref<512x70xbf16, #tpu.memory_space<vmem>>, %arg8: memref<1x70xf32, #tpu.memory_space<vmem>>, %arg9: memref<50x2xbf16, #tpu.memory_space<vmem>>, %arg10: memref<1x2xf32, #tpu.memory_space<vmem>>, %arg11: memref<8x22xf32, #tpu.memory_space<vmem>>) attributes {dimension_semantics = [#tpu.dimension_semantics<parallel>], iteration_bounds = array<i64: 1>, scalar_prefetch = 0 : i64, scratch_operands = 0 : i64, tpu.core_type = #tpu.core_type<tc>, window_params = [{transform_indices = @transform_0, window_bounds = array<i64: 8, 392>}, {pipeline_mode = #tpu.pipeline_mode<synchronous>, transform_indices = @transform_1, window_bounds = array<i64: 196, 512>}, {pipeline_mode = #tpu.pipeline_mode<synchronous>, transform_indices = @transform_2, window_bounds = array<i64: 1, 512>}, {pipeline_mode = #tpu.pipeline_mode<synchronous>, transform_indices = @transform_3, window_bounds = array<i64: 196, 512>}, {pipeline_mode = #tpu.pipeline_mode<synchronous>, transform_indices = @transform_4, window_bounds = array<i64: 1, 512>}, {pipeline_mode = #tpu.pipeline_mode<synchronous>, transform_indices = @transform_5, window_bounds = array<i64: 512, 70>}, {pipeline_mode = #tpu.pipeline_mode<synchronous>, transform_indices = @transform_6, window_bounds = array<i64: 512, 70>}, {pipeline_mode = #tpu.pipeline_mode<synchronous>, transform_indices = @transform_7, window_bounds = array<i64: 1, 70>}, {pipeline_mode = #tpu.pipeline_mode<synchronous>, transform_indices = @transform_8, window_bounds = array<i64: 50, 2>}, {pipeline_mode = #tpu.pipeline_mode<synchronous>, transform_indices = @transform_9, window_bounds = array<i64: 1, 2>}, {transform_indices = @transform_10, window_bounds = array<i64: 8, 22>}]} {
    %c0 = arith.constant 0 : index
    %c0_0 = arith.constant 0 : index
    %0 = vector.load %arg1[%c0, %c0_0] : memref<8x392xf32, #tpu.memory_space<vmem>>, vector<8x392xf32>
    %1 = vector.extract_strided_slice %0 {offsets = [0, 0], sizes = [8, 196], strides = [1, 1]} : vector<8x392xf32> to vector<8x196xf32>
    %2 = arith.truncf %1 : vector<8x196xf32> to vector<8x196xbf16>
    %3 = vector.extract_strided_slice %0 {offsets = [0, 196], sizes = [8, 196], strides = [1, 1]} : vector<8x392xf32> to vector<8x196xf32>
    %4 = arith.truncf %3 : vector<8x196xf32> to vector<8x196xbf16>
    %c0_1 = arith.constant 0 : index
    %c0_2 = arith.constant 0 : index
    %5 = vector.load %arg2[%c0_1, %c0_2] : memref<196x512xbf16, #tpu.memory_space<vmem>>, vector<196x512xbf16>
    %cst = arith.constant dense<0.000000e+00> : vector<8x512xf32>
    %6 = tpu.matmul %2, %5, %cst {dimension_numbers = #tpu.dot_dimension_numbers<[1], [0], [0], [1], [0, 0, 1, 1], [], []>} : vector<8x196xbf16>, vector<196x512xbf16>, vector<8x512xf32> -> vector<8x512xf32>
    %c0_3 = arith.constant 0 : index
    %c0_4 = arith.constant 0 : index
    %7 = vector.load %arg3[%c0_3, %c0_4] : memref<1x512xf32, #tpu.memory_space<vmem>>, vector<1x512xf32>
    %8 = vector.broadcast %7 : vector<1x512xf32> to vector<8x512xf32>
    %9 = arith.addf %6, %8 : vector<8x512xf32>
    %cst_5 = arith.constant 0.000000e+00 : f32
    %10 = vector.broadcast %cst_5 : f32 to vector<8x512xf32>
    %11 = arith.maximumf %9, %10 : vector<8x512xf32>
    %12 = arith.truncf %11 : vector<8x512xf32> to vector<8x512xbf16>
    %c0_6 = arith.constant 0 : index
    %c0_7 = arith.constant 0 : index
    %13 = vector.load %arg4[%c0_6, %c0_7] : memref<196x512xbf16, #tpu.memory_space<vmem>>, vector<196x512xbf16>
    %cst_8 = arith.constant dense<0.000000e+00> : vector<8x512xf32>
    %14 = tpu.matmul %4, %13, %cst_8 {dimension_numbers = #tpu.dot_dimension_numbers<[1], [0], [0], [1], [0, 0, 1, 1], [], []>} : vector<8x196xbf16>, vector<196x512xbf16>, vector<8x512xf32> -> vector<8x512xf32>
    %c0_9 = arith.constant 0 : index
    %c0_10 = arith.constant 0 : index
    %15 = vector.load %arg5[%c0_9, %c0_10] : memref<1x512xf32, #tpu.memory_space<vmem>>, vector<1x512xf32>
    %16 = vector.broadcast %15 : vector<1x512xf32> to vector<8x512xf32>
    %17 = arith.addf %14, %16 : vector<8x512xf32>
    %cst_11 = arith.constant 0.000000e+00 : f32
    %18 = vector.broadcast %cst_11 : f32 to vector<8x512xf32>
    %19 = arith.maximumf %17, %18 : vector<8x512xf32>
    %20 = arith.truncf %19 : vector<8x512xf32> to vector<8x512xbf16>
    %c0_12 = arith.constant 0 : index
    %c0_13 = arith.constant 0 : index
    %21 = vector.load %arg6[%c0_12, %c0_13] : memref<512x70xbf16, #tpu.memory_space<vmem>>, vector<512x70xbf16>
    %cst_14 = arith.constant dense<0.000000e+00> : vector<8x70xf32>
    %22 = tpu.matmul %12, %21, %cst_14 {dimension_numbers = #tpu.dot_dimension_numbers<[1], [0], [0], [1], [0, 0, 1, 1], [], []>} : vector<8x512xbf16>, vector<512x70xbf16>, vector<8x70xf32> -> vector<8x70xf32>
    %c0_15 = arith.constant 0 : index
    %c0_16 = arith.constant 0 : index
    %23 = vector.load %arg7[%c0_15, %c0_16] : memref<512x70xbf16, #tpu.memory_space<vmem>>, vector<512x70xbf16>
    %cst_17 = arith.constant dense<0.000000e+00> : vector<8x70xf32>
    %24 = tpu.matmul %20, %23, %cst_17 {dimension_numbers = #tpu.dot_dimension_numbers<[1], [0], [0], [1], [0, 0, 1, 1], [], []>} : vector<8x512xbf16>, vector<512x70xbf16>, vector<8x70xf32> -> vector<8x70xf32>
    %25 = arith.addf %22, %24 : vector<8x70xf32>
    %c0_18 = arith.constant 0 : index
    %c0_19 = arith.constant 0 : index
    %26 = vector.load %arg8[%c0_18, %c0_19] : memref<1x70xf32, #tpu.memory_space<vmem>>, vector<1x70xf32>
    %27 = vector.broadcast %26 : vector<1x70xf32> to vector<8x70xf32>
    %28 = arith.addf %25, %27 : vector<8x70xf32>
    %29 = vector.extract_strided_slice %28 {offsets = [0, 0], sizes = [8, 20], strides = [1, 1]} : vector<8x70xf32> to vector<8x20xf32>
    %30 = vector.extract_strided_slice %28 {offsets = [0, 20], sizes = [8, 50], strides = [1, 1]} : vector<8x70xf32> to vector<8x50xf32>
    %cst_20 = arith.constant 0.000000e+00 : f32
    %31 = vector.broadcast %cst_20 : f32 to vector<8x50xf32>
    %32 = arith.maximumf %30, %31 : vector<8x50xf32>
    %33 = arith.truncf %32 : vector<8x50xf32> to vector<8x50xbf16>
    %c0_21 = arith.constant 0 : index
    %c0_22 = arith.constant 0 : index
    %34 = vector.load %arg9[%c0_21, %c0_22] : memref<50x2xbf16, #tpu.memory_space<vmem>>, vector<50x2xbf16>
    %cst_23 = arith.constant dense<0.000000e+00> : vector<8x2xf32>
    %35 = tpu.matmul %33, %34, %cst_23 {dimension_numbers = #tpu.dot_dimension_numbers<[1], [0], [0], [1], [0, 0, 1, 1], [], []>} : vector<8x50xbf16>, vector<50x2xbf16>, vector<8x2xf32> -> vector<8x2xf32>
    %c0_24 = arith.constant 0 : index
    %c0_25 = arith.constant 0 : index
    %36 = vector.load %arg10[%c0_24, %c0_25] : memref<1x2xf32, #tpu.memory_space<vmem>>, vector<1x2xf32>
    %37 = vector.broadcast %36 : vector<1x2xf32> to vector<8x2xf32>
    %38 = arith.addf %35, %37 : vector<8x2xf32>
    %39 = tpu.concatenate %29, %38 in 1 : vector<8x20xf32>, vector<8x2xf32> -> vector<8x22xf32>
    %c0_26 = arith.constant 0 : index
    %c0_27 = arith.constant 0 : index
    %40 = vector.load %arg11[%c0_26, %c0_27] : memref<8x22xf32, #tpu.memory_space<vmem>>, vector<8x22xf32>
    tpu.vector_store %arg11[%c0_26, %c0_27], %39 {strides = array<i32>} : memref<8x22xf32, #tpu.memory_space<vmem>>, vector<8x22xf32>,
    return
  }
  func.func @transform_0(%arg0: i32) -> (i32, i32) {
    %c0_i32 = arith.constant 0 : i32
    %c0_i32_0 = arith.constant 0 : i32
    return %arg0, %c0_i32 : i32, i32
  }
  func.func @transform_1(%arg0: i32) -> (i32, i32) {
    %c0_i32 = arith.constant 0 : i32
    %c0_i32_0 = arith.constant 0 : i32
    %c0_i32_1 = arith.constant 0 : i32
    return %c0_i32, %c0_i32_0 : i32, i32
  }
  func.func @transform_2(%arg0: i32) -> (i32, i32) {
    %c0_i32 = arith.constant 0 : i32
    %c0_i32_0 = arith.constant 0 : i32
    %c0_i32_1 = arith.constant 0 : i32
    return %c0_i32, %c0_i32_0 : i32, i32
  }
  func.func @transform_3(%arg0: i32) -> (i32, i32) {
    %c0_i32 = arith.constant 0 : i32
    %c0_i32_0 = arith.constant 0 : i32
    %c0_i32_1 = arith.constant 0 : i32
    return %c0_i32, %c0_i32_0 : i32, i32
  }
  func.func @transform_4(%arg0: i32) -> (i32, i32) {
    %c0_i32 = arith.constant 0 : i32
    %c0_i32_0 = arith.constant 0 : i32
    %c0_i32_1 = arith.constant 0 : i32
    return %c0_i32, %c0_i32_0 : i32, i32
  }
  func.func @transform_5(%arg0: i32) -> (i32, i32) {
    %c0_i32 = arith.constant 0 : i32
    %c0_i32_0 = arith.constant 0 : i32
    %c0_i32_1 = arith.constant 0 : i32
    return %c0_i32, %c0_i32_0 : i32, i32
  }
  func.func @transform_6(%arg0: i32) -> (i32, i32) {
    %c0_i32 = arith.constant 0 : i32
    %c0_i32_0 = arith.constant 0 : i32
    %c0_i32_1 = arith.constant 0 : i32
    return %c0_i32, %c0_i32_0 : i32, i32
  }
  func.func @transform_7(%arg0: i32) -> (i32, i32) {
    %c0_i32 = arith.constant 0 : i32
    %c0_i32_0 = arith.constant 0 : i32
    %c0_i32_1 = arith.constant 0 : i32
    return %c0_i32, %c0_i32_0 : i32, i32
  }
  func.func @transform_8(%arg0: i32) -> (i32, i32) {
    %c0_i32 = arith.constant 0 : i32
    %c0_i32_0 = arith.constant 0 : i32
    %c0_i32_1 = arith.constant 0 : i32
    return %c0_i32, %c0_i32_0 : i32, i32
  }
  func.func @transform_9(%arg0: i32) -> (i32, i32) {
    %c0_i32 = arith.constant 0 : i32
    %c0_i32_0 = arith.constant 0 : i32
    %c0_i32_1 = arith.constant 0 : i32
    return %c0_i32, %c0_i32_0 : i32, i32
  }
  func.func @transform_10(%arg0: i32) -> (i32, i32) {
    %c0_i32 = arith.constant 0 : i32
    %c0_i32_0 = arith.constant 0 : i32
    return %arg0, %c0_i32 : i32, i32
  }
}

</mosaic_0001>

<bundles_post_ra>
// kernel: shallow_fc_forward.1
= control target key start
LH: loop header
LB: loop body
LE: loop exit
PB: predicated region body
PF: predicated region fallthrough
CT: control target
= control target key end

     0   :  { %vm366_vm0 = vcmask 556032   ;;  %s2206_s23 = smov 60   ;;  %vm370_vm1 = vcmask 1041408   ;;  %vm554_vm2 = vcmask 490496   ;;  %vm2208_vm3 = vmmov 0   ;;  %s2210_s28 = smov 20   ;;  %s2835_s0 = inlined_call_operand.vmem [shape: f32[8,392], index: 0, kind: input, shape index: {}]   ;;  %s2836_s1 = inlined_call_operand.vmem [shape: bf16[196,512], index: 1, kind: input, shape index: {}]   ;;  %s2837_s3 = inlined_call_operand.vmem [shape: bf16[196,512], index: 3, kind: input, shape index: {}]   ;;  %s2838_s6 = inlined_call_operand.vmem [shape: bf16[512,70], index: 6, kind: input, shape index: {}]   ;;  %s2839_s5 = inlined_call_operand.vmem [shape: bf16[512,70], index: 5, kind: input, shape index: {}]   ;;  %s2840_s2 = inlined_call_operand.vmem [shape: f32[1,512], index: 2, kind: input, shape index: {}]   ;;  %s2841_s4 = inlined_call_operand.vmem [shape: f32[1,512], index: 4, kind: input, shape index: {}]   ;;  %s2842_s8 = inlined_call_operand.vmem [shape: bf16[50,2], index: 8, kind: input, shape index: {}]   ;;  %s2843_s7 = inlined_call_operand.vmem [shape: f32[1,70], index: 7, kind: input, shape index: {}]   ;;  %s2844_s9 = inlined_call_operand.vmem [shape: f32[1,2], index: 9, kind: input, shape index: {}]   ;;  %s2845_s10 = inlined_call_operand.vmem [shape: f32[8,22], index: 10, kind: output, shape index: {}]  }
   0x1   :  { %v38_v0 = vld [vmem:[%s2835_s0 + $0x10] sm:$0xff]  ;;  %v37_v1 = vld [vmem:[%s2835_s0 + $0x8] sm:$0xff]  ;;  %v39_v2 = vld [vmem:[%s2835_s0 + $0x18] sm:$0xff]  ;;  %vm1637_vm4 = vcmask 1040384   ;;  %vm1633_vm5 = vcmask 408576   ;;  %vm1685_vm6 = vcmask 162816  }
   0x2   :  { %v42_v3 = vpack.c.bf16 %v38_v0, %v38_v0  ;;  %v41_v4 = vpack.c.bf16 %v37_v1, %v37_v1  ;;  %v1986_v5 = vld [vmem:[%s2836_s1 + $0x4] ss:$16 sps:$4 sm:$0xff]   ;;  %v1988_v6 = vld [vmem:[%s2836_s1] ss:$16 sps:$4 sm:$0xff]   ;;  %v43_v7 = vpack.c.bf16 %v39_v2, %v39_v2  ;;  %v1989_v8 = vld [vmem:[%s2836_s1 + $0xc] ss:$16 sps:$4 sm:$0xff]  }
   0x3   :  { %v1991_v9 = vld [vmem:[%s2836_s1 + $0x8] ss:$16 sps:$4 sm:$0xff]   ;;  %383 = vmatprep.subr.bf16.mxu0 %v1986_v5  ;;  %v1992_v10 = vld [vmem:[%s2836_s1 + $0x24] ss:$16 sps:$4 sm:$0xff]   ;;  %424 = vmatprep.subr.bf16.mxu1 %v1989_v8  ;;  %v1994_v11 = vld [vmem:[%s2836_s1 + $0x20] ss:$16 sps:$4 sm:$0xff]  }
   0x4   :  { %550 = vrot.lane.b32.xlu0 %v42_v3, %s2206_s23  ;;  %548 = vrot.lane.b32.xlu1 %v41_v4, %s2206_s23  ;;  %v1995_v12 = vld [vmem:[%s2836_s1 + $0x2c] ss:$16 sps:$4 sm:$0xff]   ;;  %v1997_v13 = vld [vmem:[%s2836_s1 + $0x28] ss:$16 sps:$4 sm:$0xff]   ;;  %vm1687_vm7 = vcmask 179200  }
   0x5   :  { %1746 = vmatprep.mubr.msk.bf16.mxu0 %vm366_vm0, %v41_v4  ;;  %384 = vmatpush1.bf16.msra.mxu0 %v1988_v6  ;;  %v1998_v14 = vld [vmem:[%s2836_s1 + $0x44] ss:$16 sps:$4 sm:$0xff]   ;;  %v2001_v15 = vld [vmem:[%s2836_s1 + $0x4c] ss:$16 sps:$4 sm:$0xff]   ;;  %v2000_v16 = vld [vmem:[%s2836_s1 + $0x40] ss:$16 sps:$4 sm:$0xff]  }
   0x6   :  { %425 = vmatpush1.bf16.msra.mxu1 %v1991_v9  ;;  %385 = vmatprep.subr.bf16.mxu0 %v1992_v10  ;;  %v2003_v17 = vld [vmem:[%s2836_s1 + $0x48] ss:$16 sps:$4 sm:$0xff]   ;;  %v2004_v18 = vld [vmem:[%s2836_s1 + $0x64] ss:$16 sps:$4 sm:$0xff]   ;;  %v2007_v19 = vld [vmem:[%s2836_s1 + $0x6c] ss:$16 sps:$4 sm:$0xff]  }
   0x7   :  { %1748 = vmatprep.mubr.msk.bf16.mxu1 %vm366_vm0, %v41_v4  ;;  %426 = vmatprep.subr.bf16.mxu1 %v1995_v12  ;;  %v2006_v20 = vld [vmem:[%s2836_s1 + $0x60] ss:$16 sps:$4 sm:$0xff]   ;;  %v2009_v21 = vld [vmem:[%s2836_s1 + $0x68] ss:$16 sps:$4 sm:$0xff]   ;;  %v2010_v22 = vld [vmem:[%s2836_s1 + $0x84] ss:$16 sps:$4 sm:$0xff]  }
   0x8   :  { %552 = vrot.lane.b32.xlu0 %v43_v7, %s2206_s23  ;;  %v2013_v23 = vld [vmem:[%s2836_s1 + $0x8c] ss:$16 sps:$4 sm:$0xff]   ;;  %v2012_v24 = vld [vmem:[%s2836_s1 + $0x80] ss:$16 sps:$4 sm:$0xff]   ;;  %v2015_v25 = vld [vmem:[%s2836_s1 + $0x88] ss:$16 sps:$4 sm:$0xff]  }
   0x9   :  { %386 = vmatpush1.bf16.msra.mxu0 %v1994_v11  ;;  %v2016_v26 = vld [vmem:[%s2836_s1 + $0xa4] ss:$16 sps:$4 sm:$0xff]   ;;  %v2019_v27 = vld [vmem:[%s2836_s1 + $0xac] ss:$16 sps:$4 sm:$0xff]   ;;  %v2018_v28 = vld [vmem:[%s2836_s1 + $0xa0] ss:$16 sps:$4 sm:$0xff]  }
   0xa   :  { %427 = vmatpush1.bf16.msra.mxu1 %v1997_v13  ;;  %387 = vmatprep.subr.bf16.mxu0 %v1998_v14  ;;  %v2021_v29 = vld [vmem:[%s2836_s1 + $0xa8] ss:$16 sps:$4 sm:$0xff]   ;;  %v2022_v30 = vld [vmem:[%s2836_s1 + $0xc4] ss:$16 sps:$4 sm:$0xff]   ;;  %v2025_v31 = vld [vmem:[%s2836_s1 + $0xcc] ss:$16 sps:$4 sm:$0xff]  }
   0xb   :  { %428 = vmatprep.subr.bf16.mxu1 %v2001_v15  ;;  %v2024_v32 = vld [vmem:[%s2836_s1 + $0xc0] ss:$16 sps:$4 sm:$0xff]   ;;  %v2027_v33 = vld [vmem:[%s2836_s1 + $0xc8] ss:$16 sps:$4 sm:$0xff]   ;;  %v2028_v34 = vld [vmem:[%s2836_s1 + $0xe4] ss:$16 sps:$4 sm:$0xff]  }
   0xc   :  { %v2031_v35 = vld [vmem:[%s2836_s1 + $0xec] ss:$16 sps:$4 sm:$0xff]   ;;  %v2030_v36 = vld [vmem:[%s2836_s1 + $0xe0] ss:$16 sps:$4 sm:$0xff]   ;;  %v2033_v37 = vld [vmem:[%s2836_s1 + $0xe8] ss:$16 sps:$4 sm:$0xff]  }
   0xd   :  { %388 = vmatpush1.bf16.msra.mxu0 %v2000_v16  ;;  %v2034_v38 = vld [vmem:[%s2836_s1 + $0x104] ss:$16 sps:$4 sm:$0xff]   ;;  %v2037_v39 = vld [vmem:[%s2836_s1 + $0x10c] ss:$16 sps:$4 sm:$0xff]   ;;  %v2036_v40 = vld [vmem:[%s2836_s1 + $0x100] ss:$16 sps:$4 sm:$0xff]  }
   0xe   :  { %429 = vmatpush1.bf16.msra.mxu1 %v2003_v17  ;;  %389 = vmatprep.subr.bf16.mxu0 %v2004_v18  ;;  %v2039_v41 = vld [vmem:[%s2836_s1 + $0x108] ss:$16 sps:$4 sm:$0xff]   ;;  %v2040_v42 = vld [vmem:[%s2836_s1 + $0x124] ss:$16 sps:$4 sm:$0xff]   ;;  %v2043_v43 = vld [vmem:[%s2836_s1 + $0x12c] ss:$16 sps:$4 sm:$0xff]  }
   0xf   :  { %430 = vmatprep.subr.bf16.mxu1 %v2007_v19  ;;  %v2042_v44 = vld [vmem:[%s2836_s1 + $0x120] ss:$16 sps:$4 sm:$0xff]   ;;  %v2045_v45 = vld [vmem:[%s2836_s1 + $0x128] ss:$16 sps:$4 sm:$0xff]   ;;  %v2046_v46 = vld [vmem:[%s2836_s1 + $0x144] ss:$16 sps:$4 sm:$0xff]  }
  0x10   :  { %v2049_v47 = vld [vmem:[%s2836_s1 + $0x14c] ss:$16 sps:$4 sm:$0xff]   ;;  %v2048_v48 = vld [vmem:[%s2836_s1 + $0x140] ss:$16 sps:$4 sm:$0xff]   ;;  %v2051_v49 = vld [vmem:[%s2836_s1 + $0x148] ss:$16 sps:$4 sm:$0xff]  }
  0x11   :  { %390 = vmatpush1.bf16.msra.mxu0 %v2006_v20  ;;  %v2052_v50 = vld [vmem:[%s2836_s1 + $0x164] ss:$16 sps:$4 sm:$0xff]   ;;  %v2055_v51 = vld [vmem:[%s2836_s1 + $0x16c] ss:$16 sps:$4 sm:$0xff]   ;;  %v2054_v54 = vld [vmem:[%s2836_s1 + $0x160] ss:$16 sps:$4 sm:$0xff]  }
  0x12   :  { %431 = vmatpush1.bf16.msra.mxu1 %v2009_v21  ;;  %391 = vmatprep.subr.bf16.mxu0 %v2010_v22  ;;  %v92_v52 = vld [vmem:[%s2836_s1 + $0x180] sm:$0x33]  ;;  %v93_v53 = vld [vmem:[%s2836_s1 + $0x188] sm:$0x33] }
  0x13   :  { %432 = vmatprep.subr.bf16.mxu1 %v2013_v23  ;;  %v2057_v55 = vld [vmem:[%s2836_s1 + $0x168] ss:$16 sps:$4 sm:$0xff]   ;;  %v1742_v56 = vcombine.high %v92_v52, %v92_v52  ;;  %v1741_v57 = vcombine.low %v92_v52, %v92_v52  ;;  %v1744_v58 = vcombine.high %v93_v53, %v93_v53  ;;  %v1743_v59 = vcombine.low %v93_v53, %v93_v53  ;;  %v36_v60 = vld [vmem:[%s2835_s0] sm:$0xff]  ;;  %v2067_v0 = vld [vmem:[%s2837_s3 + $0xc] ss:$16 sps:$4 sm:$0xff]   ;;  %s2209_s0 = smov 108  }
  0x14   :  { %v2064_v62 = vld [vmem:[%s2837_s3 + $0x4] ss:$16 sps:$4 sm:$0xff]   ;;  %v40_v1 = vpack.c.bf16 %v36_v60, %v36_v60  ;;  %v2062_v2 = vld [vmem:[%s2837_s3] ss:$16 sps:$4 sm:$0xff]   ;;  %v2065_v3 = vld [vmem:[%s2837_s3 + $0x8] ss:$16 sps:$4 sm:$0xff]  }
  0x15   :  { %392 = vmatpush1.bf16.msra.mxu0 %v2012_v24  ;;  %v372_v61 = vsel %vm370_vm1, %v1741_v57, 0  ;;  %v378_v63 = vsel %vm370_vm1, %v1743_v59, 0  ;;  %v2070_v4 = vld [vmem:[%s2837_s3 + $0x24] ss:$16 sps:$4 sm:$0xff]   ;;  %v2073_v5 = vld [vmem:[%s2837_s3 + $0x2c] ss:$16 sps:$4 sm:$0xff]  }
  0x16   :  { %433 = vmatpush1.bf16.msra.mxu1 %v2015_v25  ;;  %393 = vmatprep.subr.bf16.mxu0 %v2016_v26  ;;  %v2068_v6 = vld [vmem:[%s2837_s3 + $0x20] ss:$16 sps:$4 sm:$0xff]   ;;  %v2071_v7 = vld [vmem:[%s2837_s3 + $0x28] ss:$16 sps:$4 sm:$0xff]   ;;  %v2076_v8 = vld [vmem:[%s2837_s3 + $0x44] ss:$16 sps:$4 sm:$0xff]  }
  0x17   :  { %434 = vmatprep.subr.bf16.mxu1 %v2019_v27  ;;  %v2079_v9 = vld [vmem:[%s2837_s3 + $0x4c] ss:$16 sps:$4 sm:$0xff]   ;;  %v2074_v10 = vld [vmem:[%s2837_s3 + $0x40] ss:$16 sps:$4 sm:$0xff]   ;;  %v2077_v11 = vld [vmem:[%s2837_s3 + $0x48] ss:$16 sps:$4 sm:$0xff]  }
  0x18   :  { %v2082_v12 = vld [vmem:[%s2837_s3 + $0x64] ss:$16 sps:$4 sm:$0xff]   ;;  %v2085_v13 = vld [vmem:[%s2837_s3 + $0x6c] ss:$16 sps:$4 sm:$0xff]   ;;  %v2080_v14 = vld [vmem:[%s2837_s3 + $0x60] ss:$16 sps:$4 sm:$0xff]  }
  0x19   :  { %394 = vmatpush1.bf16.msra.mxu0 %v2018_v28  ;;  %v2083_v15 = vld [vmem:[%s2837_s3 + $0x68] ss:$16 sps:$4 sm:$0xff]   ;;  %v2088_v16 = vld [vmem:[%s2837_s3 + $0x84] ss:$16 sps:$4 sm:$0xff]   ;;  %v2091_v17 = vld [vmem:[%s2837_s3 + $0x8c] ss:$16 sps:$4 sm:$0xff]  }
  0x1a   :  { %435 = vmatpush1.bf16.msra.mxu1 %v2021_v29  ;;  %395 = vmatprep.subr.bf16.mxu0 %v2022_v30  ;;  %v2086_v18 = vld [vmem:[%s2837_s3 + $0x80] ss:$16 sps:$4 sm:$0xff]   ;;  %v2089_v19 = vld [vmem:[%s2837_s3 + $0x88] ss:$16 sps:$4 sm:$0xff]   ;;  %v2094_v20 = vld [vmem:[%s2837_s3 + $0xa4] ss:$16 sps:$4 sm:$0xff]  }
  0x1b   :  { %436 = vmatprep.subr.bf16.mxu1 %v2025_v31  ;;  %v2097_v21 = vld [vmem:[%s2837_s3 + $0xac] ss:$16 sps:$4 sm:$0xff]   ;;  %v2092_v22 = vld [vmem:[%s2837_s3 + $0xa0] ss:$16 sps:$4 sm:$0xff]   ;;  %v2095_v23 = vld [vmem:[%s2837_s3 + $0xa8] ss:$16 sps:$4 sm:$0xff]  }
  0x1c   :  { %v2100_v24 = vld [vmem:[%s2837_s3 + $0xc4] ss:$16 sps:$4 sm:$0xff]   ;;  %v2103_v25 = vld [vmem:[%s2837_s3 + $0xcc] ss:$16 sps:$4 sm:$0xff]   ;;  %v2098_v26 = vld [vmem:[%s2837_s3 + $0xc0] ss:$16 sps:$4 sm:$0xff]  }
  0x1d   :  { %396 = vmatpush1.bf16.msra.mxu0 %v2024_v32  ;;  %v2101_v27 = vld [vmem:[%s2837_s3 + $0xc8] ss:$16 sps:$4 sm:$0xff]   ;;  %v2106_v28 = vld [vmem:[%s2837_s3 + $0xe4] ss:$16 sps:$4 sm:$0xff]   ;;  %v2109_v29 = vld [vmem:[%s2837_s3 + $0xec] ss:$16 sps:$4 sm:$0xff]  }
  0x1e   :  { %437 = vmatpush1.bf16.msra.mxu1 %v2027_v33  ;;  %397 = vmatprep.subr.bf16.mxu0 %v2028_v34  ;;  %v2104_v30 = vld [vmem:[%s2837_s3 + $0xe0] ss:$16 sps:$4 sm:$0xff]   ;;  %v2107_v31 = vld [vmem:[%s2837_s3 + $0xe8] ss:$16 sps:$4 sm:$0xff]   ;;  %v2112_v32 = vld [vmem:[%s2837_s3 + $0x104] ss:$16 sps:$4 sm:$0xff]  }
  0x1f   :  { %438 = vmatprep.subr.bf16.mxu1 %v2031_v35  ;;  %v2115_v33 = vld [vmem:[%s2837_s3 + $0x10c] ss:$16 sps:$4 sm:$0xff]   ;;  %v2110_v34 = vld [vmem:[%s2837_s3 + $0x100] ss:$16 sps:$4 sm:$0xff]   ;;  %v2113_v35 = vld [vmem:[%s2837_s3 + $0x108] ss:$16 sps:$4 sm:$0xff]  }
  0x21   :  { %398 = vmatpush1.bf16.msra.mxu0 %v2030_v36  ;;  %v2118_v36 = vld [vmem:[%s2837_s3 + $0x124] ss:$16 sps:$4 sm:$0xff]  }
  0x22   :  { %439 = vmatpush1.bf16.msra.mxu1 %v2033_v37  ;;  %399 = vmatprep.subr.bf16.mxu0 %v2034_v38  ;;  %v2121_v37 = vld [vmem:[%s2837_s3 + $0x12c] ss:$16 sps:$4 sm:$0xff]   ;;  %v2116_v38 = vld [vmem:[%s2837_s3 + $0x120] ss:$16 sps:$4 sm:$0xff]  }
  0x23   :  { %440 = vmatprep.subr.bf16.mxu1 %v2037_v39  ;;  %v2119_v39 = vld [vmem:[%s2837_s3 + $0x128] ss:$16 sps:$4 sm:$0xff]  }
  0x25   :  { %400 = vmatpush1.bf16.msra.mxu0 %v2036_v40  ;;  %v2124_v40 = vld [vmem:[%s2837_s3 + $0x144] ss:$16 sps:$4 sm:$0xff]  }
  0x26   :  { %441 = vmatpush1.bf16.msra.mxu1 %v2039_v41  ;;  %401 = vmatprep.subr.bf16.mxu0 %v2040_v42  ;;  %v2127_v41 = vld [vmem:[%s2837_s3 + $0x14c] ss:$16 sps:$4 sm:$0xff]   ;;  %v2122_v42 = vld [vmem:[%s2837_s3 + $0x140] ss:$16 sps:$4 sm:$0xff]  }
  0x27   :  { %442 = vmatprep.subr.bf16.mxu1 %v2043_v43  ;;  %v2125_v43 = vld [vmem:[%s2837_s3 + $0x148] ss:$16 sps:$4 sm:$0xff]  }
  0x29   :  { %402 = vmatpush1.bf16.msra.mxu0 %v2042_v44  ;;  %v2130_v44 = vld [vmem:[%s2837_s3 + $0x164] ss:$16 sps:$4 sm:$0xff]  }
  0x2a   :  { %443 = vmatpush1.bf16.msra.mxu1 %v2045_v45  ;;  %403 = vmatprep.subr.bf16.mxu0 %v2046_v46  ;;  %v2133_v45 = vld [vmem:[%s2837_s3 + $0x16c] ss:$16 sps:$4 sm:$0xff]   ;;  %v521_v46 = vld [vmem:[%s2837_s3 + $0x180] sm:$0x33] }
  0x2b   :  { %444 = vmatprep.subr.bf16.mxu1 %v2049_v47  ;;  %v522_v47 = vld [vmem:[%s2837_s3 + $0x188] sm:$0x33] }
  0x2c   :  { %v1800_v52 = vcombine.high %v522_v47, %v522_v47  ;;  %v1799_v53 = vcombine.low %v522_v47, %v522_v47 }
  0x2d   :  { %404 = vmatpush1.bf16.msra.mxu0 %v2048_v48  ;;  %v2128_v48 = vld [vmem:[%s2837_s3 + $0x160] ss:$16 sps:$4 sm:$0xff]  }
  0x2e   :  { %445 = vmatpush1.bf16.msra.mxu1 %v2051_v49  ;;  %405 = vmatprep.subr.bf16.mxu0 %v2052_v50  ;;  %v2131_v49 = vld [vmem:[%s2837_s3 + $0x168] ss:$16 sps:$4 sm:$0xff]   ;;  %v1798_v50 = vcombine.high %v521_v46, %v521_v46 }
  0x2f   :  { %446 = vmatprep.subr.bf16.mxu1 %v2055_v51  ;;  %v1797_v51 = vcombine.low %v521_v46, %v521_v46 }
  0x31   :  { %406 = vmatpush1.bf16.msra.mxu0 %v2054_v54  ;;  %v812_v54 = vsel %vm370_vm1, %v1797_v51, 0 }
  0x32   :  { %447 = vmatpush1.bf16.msra.mxu1 %v2057_v55  ;;  %1745 = vmatprep.subr.msk.bf16.mxu0 %vm370_vm1, %v1742_v56  ;;  %v818_v55 = vsel %vm370_vm1, %v1799_v53, 0 }
  0x33   :  { %1747 = vmatprep.subr.msk.bf16.mxu1 %vm370_vm1, %v1744_v58 }
  0x35   :  { %408 = vmatpush1.bf16.msra.mxu0 %v372_v61  ;;  %v2138_v61 = vld [vmem:[%s2838_s6 + $0x40] sm:$0xff]  }
  0x36   :  { %449 = vmatpush1.bf16.msra.mxu1 %v378_v63  ;;  %823 = vmatprep.subr.bf16.mxu0 %v2064_v62  ;;  %v2139_v62 = vld [vmem:[%s2838_s6 + $0xc0] sm:$0xff]  }
  0x37   :  { %864 = vmatprep.subr.bf16.mxu1 %v2067_v0  ;;  %v2140_v63 = vld [vmem:[%s2838_s6] sm:$0xff]  }
  0x38   :  { %416 = vmatmul.mubr.bf16.vlgmr.msra.gmra.mrb[0].mxu0 %v40_v1  ;;  %v2141_v0 = vld [vmem:[%s2838_s6 + $0x80] sm:$0xff]  }
  0x39   :  { %457 = vmatmul.mubr.bf16.vlgmr.msra.gmra.mrb[0].mxu1 %v40_v1  ;;  %824 = vmatpush1.bf16.msra.mxu0 %v2062_v2  ;;  %v2142_v1 = vld [vmem:[%s2838_s6 + $0x48] sm:$0xff]  }
  0x3a   :  { %865 = vmatpush1.bf16.msra.mxu1 %v2065_v3  ;;  %825 = vmatprep.subr.bf16.mxu0 %v2070_v4  ;;  %v2143_v2 = vld [vmem:[%s2838_s6 + $0xc8] sm:$0xff]  }
  0x3b   :  { %866 = vmatprep.subr.bf16.mxu1 %v2073_v5  ;;  %v2144_v3 = vld [vmem:[%s2838_s6 + $0x8] sm:$0xff]   ;;  %v2146_v5 = vld [vmem:[%s2838_s6 + $0x50] sm:$0xff]  }
  0x3c   :  { %v2145_v4 = vld [vmem:[%s2838_s6 + $0x88] sm:$0xff]  }
  0x3d   :  { %826 = vmatpush1.bf16.msra.mxu0 %v2068_v6  ;;  %v2147_v6 = vld [vmem:[%s2838_s6 + $0xd0] sm:$0xff]  }
  0x3e   :  { %867 = vmatpush1.bf16.msra.mxu1 %v2071_v7  ;;  %827 = vmatprep.subr.bf16.mxu0 %v2076_v8  ;;  %v2148_v7 = vld [vmem:[%s2838_s6 + $0x10] sm:$0xff]  }
  0x3f   :  { %868 = vmatprep.subr.bf16.mxu1 %v2079_v9  ;;  %v2149_v8 = vld [vmem:[%s2838_s6 + $0x90] sm:$0xff]   ;;  %v2150_v9 = vld [vmem:[%s2838_s6 + $0x58] sm:$0xff]  }
  0x41   :  { %828 = vmatpush1.bf16.msra.mxu0 %v2074_v10  ;;  %v2151_v10 = vld [vmem:[%s2838_s6 + $0xd8] sm:$0xff]  }
  0x42   :  { %869 = vmatpush1.bf16.msra.mxu1 %v2077_v11  ;;  %829 = vmatprep.subr.bf16.mxu0 %v2082_v12  ;;  %v2152_v11 = vld [vmem:[%s2838_s6 + $0x18] sm:$0xff]  }
  0x43   :  { %870 = vmatprep.subr.bf16.mxu1 %v2085_v13  ;;  %v2153_v12 = vld [vmem:[%s2838_s6 + $0x98] sm:$0xff]   ;;  %v2154_v13 = vld [vmem:[%s2838_s6 + $0x60] sm:$0xff]  }
  0x45   :  { %830 = vmatpush1.bf16.msra.mxu0 %v2080_v14  ;;  %v2155_v14 = vld [vmem:[%s2838_s6 + $0xe0] sm:$0xff]  }
  0x46   :  { %871 = vmatpush1.bf16.msra.mxu1 %v2083_v15  ;;  %831 = vmatprep.subr.bf16.mxu0 %v2088_v16  ;;  %v2156_v15 = vld [vmem:[%s2838_s6 + $0x20] sm:$0xff]  }
  0x47   :  { %872 = vmatprep.subr.bf16.mxu1 %v2091_v17  ;;  %v2157_v16 = vld [vmem:[%s2838_s6 + $0xa0] sm:$0xff]   ;;  %v2158_v17 = vld [vmem:[%s2838_s6 + $0x68] sm:$0xff]  }
  0x49   :  { %832 = vmatpush1.bf16.msra.mxu0 %v2086_v18  ;;  %v2159_v18 = vld [vmem:[%s2838_s6 + $0xe8] sm:$0xff]  }
  0x4a   :  { %873 = vmatpush1.bf16.msra.mxu1 %v2089_v19  ;;  %833 = vmatprep.subr.bf16.mxu0 %v2094_v20  ;;  %v2160_v19 = vld [vmem:[%s2838_s6 + $0x28] sm:$0xff]  }
  0x4b   :  { %874 = vmatprep.subr.bf16.mxu1 %v2097_v21  ;;  %v2161_v20 = vld [vmem:[%s2838_s6 + $0xa8] sm:$0xff]   ;;  %v2162_v21 = vld [vmem:[%s2838_s6 + $0x70] sm:$0xff]  }
  0x4d   :  { %834 = vmatpush1.bf16.msra.mxu0 %v2092_v22  ;;  %v2163_v22 = vld [vmem:[%s2838_s6 + $0xf0] sm:$0xff]  }
  0x4e   :  { %875 = vmatpush1.bf16.msra.mxu1 %v2095_v23  ;;  %835 = vmatprep.subr.bf16.mxu0 %v2100_v24  ;;  %v2164_v23 = vld [vmem:[%s2838_s6 + $0x30] sm:$0xff]  }
  0x4f   :  { %876 = vmatprep.subr.bf16.mxu1 %v2103_v25  ;;  %v2165_v24 = vld [vmem:[%s2838_s6 + $0xb0] sm:$0xff]   ;;  %v2166_v25 = vld [vmem:[%s2838_s6 + $0x78] sm:$0xff]  }
  0x51   :  { %836 = vmatpush1.bf16.msra.mxu0 %v2098_v26  ;;  %v2167_v26 = vld [vmem:[%s2838_s6 + $0xf8] sm:$0xff]  }
  0x52   :  { %877 = vmatpush1.bf16.msra.mxu1 %v2101_v27  ;;  %837 = vmatprep.subr.bf16.mxu0 %v2106_v28  ;;  %v2168_v27 = vld [vmem:[%s2838_s6 + $0x38] sm:$0xff]  }
  0x53   :  { %878 = vmatprep.subr.bf16.mxu1 %v2109_v29  ;;  %v2169_v28 = vld [vmem:[%s2838_s6 + $0xb8] sm:$0xff]   ;;  %v2170_v29 = vld [vmem:[%s2839_s5 + $0x40] sm:$0xff]  }
  0x55   :  { %838 = vmatpush1.bf16.msra.mxu0 %v2104_v30  ;;  %v2171_v30 = vld [vmem:[%s2839_s5 + $0xc0] sm:$0xff]  }
  0x56   :  { %879 = vmatpush1.bf16.msra.mxu1 %v2107_v31  ;;  %839 = vmatprep.subr.bf16.mxu0 %v2112_v32 }
  0x57   :  { %880 = vmatprep.subr.bf16.mxu1 %v2115_v33 }
  0x59   :  { %840 = vmatpush1.bf16.msra.mxu0 %v2110_v34 }
  0x5a   :  { %881 = vmatpush1.bf16.msra.mxu1 %v2113_v35  ;;  %841 = vmatprep.subr.bf16.mxu0 %v2118_v36 }
  0x5b   :  { %882 = vmatprep.subr.bf16.mxu1 %v2121_v37 }
  0x5d   :  { %842 = vmatpush1.bf16.msra.mxu0 %v2116_v38 }
  0x5e   :  { %883 = vmatpush1.bf16.msra.mxu1 %v2119_v39  ;;  %843 = vmatprep.subr.bf16.mxu0 %v2124_v40  ;;  %v96_v39 = vlaneseq }
  0x5f   :  { %884 = vmatprep.subr.bf16.mxu1 %v2127_v41 }
  0x60   :  { %v2696_v40 = vshrl.u32 %v96_v39, 7 }
  0x61   :  { %844 = vmatpush1.bf16.msra.mxu0 %v2122_v42 }
  0x62   :  { %885 = vmatpush1.bf16.msra.mxu1 %v2125_v43  ;;  %845 = vmatprep.subr.bf16.mxu0 %v2130_v44  ;;  %v102_v41 = vsub.s32 1, %v2696_v40  ;;  %v110_v42 = vsub.s32 3, %v2696_v40  ;;  %v2703_v43 = vld [vmem:[%s2840_s2] sm:$0xf]  ;;  %v106_v46 = vsub.s32 2, %v2696_v40 }
  0x63   :  { %886 = vmatprep.subr.bf16.mxu1 %v2133_v45  ;;  %v523_v44 = vld [vmem:[%s2841_s4] sm:$0xf]  ;;  %v98_v45 = vsub.s32 0, %v2696_v40  ;;  %v2197_v40 = vld [vmem:[%s2839_s5 + $0xb0] sm:$0xff]  }
  0x64   :  { %v103_v47 = vrot.slane %v2703_v43, %v102_v41  ;;  %v532_v51 = vrot.slane %v523_v44, %v102_v41  ;;  %v107_v41 = vrot.slane %v2703_v43, %v106_v46 }
  0x65   :  { %846 = vmatpush1.bf16.msra.mxu0 %v2128_v48  ;;  %v111_v48 = vrot.slane %v2703_v43, %v110_v42  ;;  %v99_v39 = vrot.slane %v2703_v43, %v98_v45 }
  0x66   :  { %887 = vmatpush1.bf16.msra.mxu1 %v2131_v49  ;;  %1801 = vmatprep.subr.msk.bf16.mxu0 %vm370_vm1, %v1798_v50  ;;  %v528_v49 = vrot.slane %v523_v44, %v98_v45  ;;  %v536_v50 = vrot.slane %v523_v44, %v106_v46  ;;  %v2196_v45 = vld [vmem:[%s2839_s5 + $0x30] sm:$0xff]  }
  0x67   :  { %1803 = vmatprep.subr.msk.bf16.mxu1 %vm370_vm1, %v1800_v52  ;;  %v540_v52 = vrot.slane %v523_v44, %v110_v42  ;;  %v2194_v42 = vld [vmem:[%s2839_s5 + $0x70] sm:$0xff]  }
  0x68   :  { %v2195_v44 = vld [vmem:[%s2839_s5 + $0xf0] sm:$0xff]  }
  0x69   :  { %848 = vmatpush1.bf16.msra.mxu0 %v812_v54 }
  0x6a   :  { %889 = vmatpush1.bf16.msra.mxu1 %v818_v55  ;;  %1876 = vmatprep.subr.bf16.mxu0 %v2138_v61 }
  0x6b   :  { %1898 = vmatprep.subr.bf16.mxu1 %v2139_v62 }
  0x76   :  { %v551_v56 = vpop.permute.xlu0 %550  ;;  %v549_v57 = vpop.permute.xlu1 %548 }
  0x77   :  { %v555_v60 = vsel %vm554_vm2, %v549_v57, %v551_v56 }
  0x7a   :  { %v553_v58 = vpop.permute.xlu0 %552 }
  0x7b   :  { %v556_v59 = vsel %vm554_vm2, %v551_v56, %v553_v58 }
  0x7c   :  { %1802 = vmatprep.mubr.msk.bf16.mxu0 %vm366_vm0, %v556_v59  ;;  %1804 = vmatprep.mubr.msk.bf16.mxu1 %vm366_vm0, %v556_v59 }
  0x7d   :  { %856 = vmatmul.mubr.bf16.vlgmr.msra.gmra.mrb[4].mxu0 %v555_v60  ;;  %897 = vmatmul.mubr.bf16.vlgmr.msra.gmra.mrb[4].mxu1 %v555_v60 }
  0x7e   :  { %1877 = vmatpush3.bf16.msra.mxu0 %v2140_v63  ;;  %1899 = vmatpush3.bf16.msra.mxu1 %v2141_v0 }
  0x7f   :  { %1878 = vmatprep.subr.bf16.mxu0 %v2142_v1  ;;  %1900 = vmatprep.subr.bf16.mxu1 %v2143_v2 }
  0x82   :  { %1879 = vmatpush3.bf16.msra.mxu0 %v2144_v3  ;;  %1901 = vmatpush3.bf16.msra.mxu1 %v2145_v4 }
  0x83   :  { %1880 = vmatprep.subr.bf16.mxu0 %v2146_v5  ;;  %1902 = vmatprep.subr.bf16.mxu1 %v2147_v6 }
  0x86   :  { %1881 = vmatpush3.bf16.msra.mxu0 %v2148_v7  ;;  %1903 = vmatpush3.bf16.msra.mxu1 %v2149_v8 }
  0x87   :  { %1882 = vmatprep.subr.bf16.mxu0 %v2150_v9  ;;  %1904 = vmatprep.subr.bf16.mxu1 %v2151_v10 }
  0x8a   :  { %1883 = vmatpush3.bf16.msra.mxu0 %v2152_v11  ;;  %1905 = vmatpush3.bf16.msra.mxu1 %v2153_v12  ;;  %v2172_v11 = vld [vmem:[%s2839_s5] sm:$0xff]  }
  0x8b   :  { %1884 = vmatprep.subr.bf16.mxu0 %v2154_v13  ;;  %1906 = vmatprep.subr.bf16.mxu1 %v2155_v14  ;;  %v2173_v12 = vld [vmem:[%s2839_s5 + $0x80] sm:$0xff]  }
  0x8e   :  { %1885 = vmatpush3.bf16.msra.mxu0 %v2156_v15  ;;  %1907 = vmatpush3.bf16.msra.mxu1 %v2157_v16  ;;  %v2174_v15 = vld [vmem:[%s2839_s5 + $0x48] sm:$0xff]  }
  0x8f   :  { %1886 = vmatprep.subr.bf16.mxu0 %v2158_v17  ;;  %1908 = vmatprep.subr.bf16.mxu1 %v2159_v18  ;;  %v2175_v16 = vld [vmem:[%s2839_s5 + $0xc8] sm:$0xff]  }
  0x92   :  { %1887 = vmatpush3.bf16.msra.mxu0 %v2160_v19  ;;  %1909 = vmatpush3.bf16.msra.mxu1 %v2161_v20  ;;  %v2176_v19 = vld [vmem:[%s2839_s5 + $0x8] sm:$0xff]  }
  0x93   :  { %1888 = vmatprep.subr.bf16.mxu0 %v2162_v21  ;;  %1910 = vmatprep.subr.bf16.mxu1 %v2163_v22  ;;  %v2177_v20 = vld [vmem:[%s2839_s5 + $0x88] sm:$0xff]   ;;  %v2178_v21 = vld [vmem:[%s2839_s5 + $0x50] sm:$0xff]  }
  0x94   :  { %v2179_v22 = vld [vmem:[%s2839_s5 + $0xd0] sm:$0xff]  }
  0x96   :  { %1889 = vmatpush3.bf16.msra.mxu0 %v2164_v23  ;;  %1911 = vmatpush3.bf16.msra.mxu1 %v2165_v24  ;;  %v2180_v23 = vld [vmem:[%s2839_s5 + $0x10] sm:$0xff]  }
  0x97   :  { %1890 = vmatprep.subr.bf16.mxu0 %v2166_v25  ;;  %1912 = vmatprep.subr.bf16.mxu1 %v2167_v26  ;;  %v2181_v24 = vld [vmem:[%s2839_s5 + $0x90] sm:$0xff]   ;;  %v2182_v25 = vld [vmem:[%s2839_s5 + $0x58] sm:$0xff]  }
  0x98   :  { %v2183_v26 = vld [vmem:[%s2839_s5 + $0xd8] sm:$0xff]  }
  0x9a   :  { %1891 = vmatpush3.bf16.msra.mxu0 %v2168_v27  ;;  %1913 = vmatpush3.bf16.msra.mxu1 %v2169_v28  ;;  %v2184_v27 = vld [vmem:[%s2839_s5 + $0x18] sm:$0xff]  }
  0x9b   :  { %1920 = vmatprep.subr.bf16.mxu0 %v2170_v29  ;;  %1942 = vmatprep.subr.bf16.mxu1 %v2171_v30  ;;  %v2185_v28 = vld [vmem:[%s2839_s5 + $0x98] sm:$0xff]   ;;  %v2186_v29 = vld [vmem:[%s2839_s5 + $0x60] sm:$0xff]  }
  0x9c   :  { %v2187_v30 = vld [vmem:[%s2839_s5 + $0xe0] sm:$0xff]  }
 0x10b   :  { %v2692_v31 = vpop.f32.mrb[0].mxu0 }
 0x10c   :  { %v419_v32 = vpop.f32.mrb[1].mxu0  ;;  %v2694_v33 = vpop.f32.mrb[0].mxu1  ;;  %v418_v43 = vadd.f32 %v2692_v31, %v99_v39  ;;  %v2201_v31 = vld [vmem:[%s2839_s5 + $0xb8] sm:$0xff]  }
 0x10d   :  { %v421_v34 = vpop.f32.mrb[2].mxu0  ;;  %v460_v35 = vpop.f32.mrb[1].mxu1  ;;  %v420_v55 = vadd.f32 %v419_v32, %v103_v47  ;;  %v2188_v32 = vld [vmem:[%s2839_s5 + $0x20] sm:$0xff]   ;;  %v459_v46 = vadd.f32 %v2694_v33, %v107_v41  ;;  %v2198_v47 = vld [vmem:[%s2839_s5 + $0x78] sm:$0xff]  }
 0x10e   :  { %v422_v36 = vpop.f32.mrb[3].mxu0  ;;  %v462_v37 = vpop.f32.mrb[2].mxu1  ;;  %v461_v56 = vadd.f32 %v460_v35, %v111_v48  ;;  %v2189_v34 = vld [vmem:[%s2839_s5 + $0xa0] sm:$0xff]   ;;  %v2190_v35 = vld [vmem:[%s2839_s5 + $0x68] sm:$0xff]   ;;  %v2199_v48 = vld [vmem:[%s2839_s5 + $0xf8] sm:$0xff]   ;;  %v465_v33 = vmax.f32 %v418_v43, 0.0 }
 0x10f   :  { %v463_v38 = vpop.f32.mrb[3].mxu1  ;;  %v466_v7 = vmax.f32 %v420_v55, 0.0  ;;  %v2191_v36 = vld [vmem:[%s2839_s5 + $0xe8] sm:$0xff]  }
 0x110   :  { %v468_v8 = vmax.f32 %v461_v56, 0.0  ;;  %v2192_v37 = vld [vmem:[%s2839_s5 + $0x28] sm:$0xff]   ;;  %v2204_v56 = vld [vmem:[%s2842_s8 + $0x10] sm:$0xff]  }
 0x111   :  { %v470_v17 = vpack.c.bf16 %v466_v7, %v466_v7  ;;  %v2193_v38 = vld [vmem:[%s2839_s5 + $0xa8] sm:$0xff]  }
 0x112   :  { %v472_v18 = vpack.c.bf16 %v468_v8, %v468_v8  ;;  %v2203_v55 = vld [vmem:[%s2842_s8 + $0x8] sm:$0xff]  }
 0x150   :  { %v857_v53 = vpop.f32.mrb[4].mxu0  ;;  %v898_v54 = vpop.f32.mrb[4].mxu1 }
 0x151   :  { %v858_v57 = vadd.f32 %v857_v53, %v528_v49  ;;  %v899_v58 = vadd.f32 %v898_v54, %v536_v50  ;;  %v859_v59 = vpop.f32.mrb[5].mxu0  ;;  %v900_v60 = vpop.f32.mrb[5].mxu1  ;;  %v2200_v49 = vld [vmem:[%s2839_s5 + $0x38] sm:$0xff]   ;;  %v467_v50 = vmax.f32 %v459_v46, 0.0  ;;  %v2207_v53 = vmov 0.0   ;;  %v2202_v54 = vld [vmem:[%s2842_s8] sm:$0xff]  }
 0x152   :  { %v860_v61 = vadd.f32 %v859_v59, %v532_v51  ;;  %v901_v62 = vadd.f32 %v900_v60, %v540_v52  ;;  %v861_v63 = vpop.f32.mrb[6].mxu0  ;;  %v902_v0 = vpop.f32.mrb[6].mxu1  ;;  %v469_v51 = vpack.c.bf16 %v465_v33, %v465_v33 }
 0x153   :  { %v905_v1 = vmax.f32 %v858_v57, 0.0  ;;  %v907_v2 = vmax.f32 %v899_v58, 0.0  ;;  %v862_v3 = vpop.f32.mrb[7].mxu0  ;;  %v903_v4 = vpop.f32.mrb[7].mxu1  ;;  %v471_v52 = vpack.c.bf16 %v467_v50, %v467_v50 }
 0x154   :  { %v906_v5 = vmax.f32 %v860_v61, 0.0  ;;  %v908_v6 = vmax.f32 %v901_v62, 0.0  ;;  %v2205_v57 = vld [vmem:[%s2842_s8 + $0x18] ss:$0 sps:$4 sm:$0x11]  }
 0x155   :  { %v909_v13 = vpack.c.bf16 %v905_v1, %v905_v1  ;;  %v911_v14 = vpack.c.bf16 %v907_v2, %v907_v2  ;;  %v1639_v58 = vsel %vm1637_vm4, %v2205_v57, 0 }
 0x156   :  { %v910_v9 = vpack.c.bf16 %v906_v5, %v906_v5  ;;  %v912_v10 = vpack.c.bf16 %v908_v6, %v908_v6 }
 0x158   :  { %1265 = vmatprep.mubr.bf16.mxu0 %v910_v9  ;;  %1305 = vmatprep.mubr.bf16.mxu1 %v912_v10 }
 0x159   :  { %1266 = vmatmul.mubr.bf16.vlgmr.msra.gmra.mrb[8].mxu0 %v909_v13  ;;  %1306 = vmatmul.mubr.bf16.vlgmr.msra.gmra.mrb[8].mxu1 %v911_v14 }
 0x15a   :  { %1921 = vmatpush3.bf16.msra.mxu0 %v2172_v11  ;;  %1943 = vmatpush3.bf16.msra.mxu1 %v2173_v12 }
 0x15b   :  { %1537 = vmatprep.mubr.bf16.mxu0 %v470_v17  ;;  %1577 = vmatprep.mubr.bf16.mxu1 %v472_v18  ;;  %v1869_v17 = vld [vmem:[%s2843_s7] ss:$0 sm:$0xff] }
 0x15c   :  { %1922 = vmatprep.subr.bf16.mxu0 %v2174_v15  ;;  %1944 = vmatprep.subr.bf16.mxu1 %v2175_v16 }
 0x15e   :  { %1923 = vmatpush3.bf16.msra.mxu0 %v2176_v19  ;;  %1945 = vmatpush3.bf16.msra.mxu1 %v2177_v20 }
 0x15f   :  { %1924 = vmatprep.subr.bf16.mxu0 %v2178_v21  ;;  %1946 = vmatprep.subr.bf16.mxu1 %v2179_v22 }
 0x162   :  { %1925 = vmatpush3.bf16.msra.mxu0 %v2180_v23  ;;  %1947 = vmatpush3.bf16.msra.mxu1 %v2181_v24  ;;  %v1870_v23 = vld [vmem:[%s2844_s9] ss:$0 sm:$0xff] }
 0x163   :  { %1926 = vmatprep.subr.bf16.mxu0 %v2182_v25  ;;  %1948 = vmatprep.subr.bf16.mxu1 %v2183_v26 }
 0x166   :  { %1927 = vmatpush3.bf16.msra.mxu0 %v2184_v27  ;;  %1949 = vmatpush3.bf16.msra.mxu1 %v2185_v28 }
 0x167   :  { %1928 = vmatprep.subr.bf16.mxu0 %v2186_v29  ;;  %1950 = vmatprep.subr.bf16.mxu1 %v2187_v30 }
 0x16a   :  { %1929 = vmatpush3.bf16.msra.mxu0 %v2188_v32  ;;  %1951 = vmatpush3.bf16.msra.mxu1 %v2189_v34 }
 0x16b   :  { %1930 = vmatprep.subr.bf16.mxu0 %v2190_v35  ;;  %1952 = vmatprep.subr.bf16.mxu1 %v2191_v36 }
 0x16e   :  { %1931 = vmatpush3.bf16.msra.mxu0 %v2192_v37  ;;  %1953 = vmatpush3.bf16.msra.mxu1 %v2193_v38 }
 0x16f   :  { %1932 = vmatprep.subr.bf16.mxu0 %v2194_v42  ;;  %1954 = vmatprep.subr.bf16.mxu1 %v2195_v44 }
 0x172   :  { %1933 = vmatpush3.bf16.msra.mxu0 %v2196_v45  ;;  %1955 = vmatpush3.bf16.msra.mxu1 %v2197_v40 }
 0x173   :  { %1934 = vmatprep.subr.bf16.mxu0 %v2198_v47  ;;  %1956 = vmatprep.subr.bf16.mxu1 %v2199_v48 }
 0x176   :  { %1935 = vmatpush3.bf16.msra.mxu0 %v2200_v49  ;;  %1957 = vmatpush3.bf16.msra.mxu1 %v2201_v31 }
 0x177   :  { %1969 = vmatprep.subr.bf16.mxu0 %v2207_v53 }
 0x179   :  { %1538 = vmatmul.mubr.bf16.vlgmr.msra.gmra.mrb[12].mxu0 %v469_v51  ;;  %1578 = vmatmul.mubr.bf16.vlgmr.msra.gmra.mrb[12].mxu1 %v471_v52 }
 0x17a   :  { %1977 = vmatprep.mubr.msk.bf16.mxu0 %vm2208_vm3, %v2207_v53  ;;  %1970 = vmatpush3.bf16.msra.mxu0 %v2202_v54 }
 0x17b   :  { %1971 = vmatprep.subr.bf16.mxu0 %v2207_v53 }
 0x17e   :  { %1972 = vmatpush3.bf16.msra.mxu0 %v2203_v55 }
 0x17f   :  { %1973 = vmatprep.subr.bf16.mxu0 %v2207_v53 }
 0x182   :  { %1974 = vmatpush3.bf16.msra.mxu0 %v2204_v56 }
 0x183   :  { %1975 = vmatprep.subr.bf16.mxu0 %v2207_v53 }
 0x186   :  { %1976 = vmatpush3.bf16.msra.mxu0 %v1639_v58 }
 0x22c   :  { %v1892_v59 = vpop.f32.mrb[8].mxu0  ;;  %v1914_v60 = vpop.f32.mrb[8].mxu1 }
 0x22d   :  { %v1893_v61 = vpop.f32.mrb[9].mxu0  ;;  %v1915_v62 = vpop.f32.mrb[9].mxu1 }
 0x22e   :  { %v1894_v63 = vadd.f32 %v1893_v61, %v1892_v59  ;;  %v1916_v0 = vadd.f32 %v1915_v62, %v1914_v60  ;;  %v1895_v1 = vpop.f32.mrb[10].mxu0  ;;  %v1917_v2 = vpop.f32.mrb[10].mxu1 }
 0x22f   :  { %v1896_v3 = vpop.f32.mrb[11].mxu0  ;;  %v1918_v4 = vpop.f32.mrb[11].mxu1 }
 0x230   :  { %v1308_v5 = vadd.f32 %v1916_v0, %v1894_v63 }
 0x24c   :  { %v1936_v6 = vpop.f32.mrb[12].mxu0  ;;  %v1958_v7 = vpop.f32.mrb[12].mxu1 }
 0x24d   :  { %v1937_v8 = vpop.f32.mrb[13].mxu0  ;;  %v1959_v9 = vpop.f32.mrb[13].mxu1 }
 0x24e   :  { %v1938_v10 = vadd.f32 %v1937_v8, %v1936_v6  ;;  %v1960_v11 = vadd.f32 %v1959_v9, %v1958_v7  ;;  %v1939_v12 = vpop.f32.mrb[14].mxu0  ;;  %v1961_v13 = vpop.f32.mrb[14].mxu1 }
 0x24f   :  { %v1940_v14 = vpop.f32.mrb[15].mxu0  ;;  %v1962_v15 = vpop.f32.mrb[15].mxu1 }
 0x250   :  { %v1540_v16 = vadd.f32 %v1938_v10, %v1308_v5 }
 0x252   :  { %v1580_v18 = vadd.f32 %v1960_v11, %v1540_v16 }
 0x254   :  { %v1592_v19 = vadd.f32 %v1869_v17, %v1580_v18 }
 0x256   :  { %v1593_v20 = vmax.f32 %v1592_v19, 0.0 }
 0x258   :  { %v1594_v21 = vpack.c.bf16 %v1593_v20, %v1593_v20 }
 0x25a   :  { %1610 = vrot.lane.b32.xlu1 %v1594_v21, %s2209_s0 }
 0x2cc   :  { %v1611_v22 = vpop.permute.xlu1 %1610 }
 0x2cd   :  { %1978 = vmatmul.mubr.msk.bf16.vlgmr.msra.gmra.mrb[16].mxu0 %vm1633_vm5, %v1611_v22 }
 0x3a0   :  { %v1675_v24 = vpop.f32.mrb[16].mxu0 }
 0x3a1   :  { %v1676_v25 = vadd.f32 %v1870_v23, %v1675_v24  ;;  %v1979_v26 = vpop.f32.mrb[17].mxu0 }
 0x3a2   :  { %v1678_v27 = vpop.f32.mrb[18].mxu0 }
 0x3a3   :  { %1682 = vrot.lane.b32.xlu0 %v1676_v25, %s2210_s28  ;;  %v1980_v28 = vpop.f32.mrb[19].mxu0 }
 0x415   :  { %v1683_v29 = vpop.permute.xlu0 %1682 }
 0x416   :  { %v1686_v30 = vsel %vm1685_vm6, %v1592_v19, %v1683_v29 }
 0x417   :  { %1688 = vst.msk [vmem:[%s2845_s10] sm:$0xff] %vm1687_vm7, %v1686_v30 }

</bundles_post_ra>
